<compile_context>
chip_gen: v6e
topology: v6e:2x2x1
jax: 0.10.0
libtpu: 0.0.40
codegen_flags: <defaults>
</compile_context>

<pallas_src>
import jax
import jax.numpy as jnp
from jax.experimental import pallas as pl
from jax.experimental.pallas import tpu as pltpu


# --------------------------- kernel 1: GCN + ReLU --------------------------- #

def gcn_kernel(adj_ref, hw_ref, b_ref, x_ref):
    """One row tile of the GraphConv + ReLU.

    adj_ref : (tm, N) row tile of the dense adjacency
    hw_ref  : (N, F)  (deg^{-1/2} * h) @ W  (column-side norm folded in), resident
    b_ref   : (1, F)  bias, resident
    x_ref   : (tm, F) output tile of x = relu(GCN)
    """
    a = adj_ref[...]
    # Row-side deg^{-1/2} from the resident adjacency tile: no (N,1) lane-padded
    # operand, no extra DMA stream.  Zero-degree rows -> 0 (DGL 'both').
    deg_i = jnp.sum(a, axis=1, keepdims=True)                       # (tm, 1)
    d_i = jnp.where(deg_i > 0.0,
                    jax.lax.rsqrt(jnp.maximum(deg_i, 1e-30)), 0.0)
    z = d_i * jnp.dot(a, hw_ref[...],
                      preferred_element_type=jnp.float32) + b_ref[...]
    # TODO(synk): training-mode dropout (pltpu.prng_*) not implemented; inference = identity.
    x_ref[...] = jnp.maximum(z, 0.0)


# ------------------------------ kernel 2: gram ------------------------------ #

def gram_kernel(x_tile_ref, xt_ref, o_ref):
    """o_i = x_i @ x^T as a canonical (tm, F) @ (F, N) MXU matmul.

    x_tile_ref : (tm, F)  rows of x for this tile
    xt_ref     : (F, N)   full x^T, resident
    o_ref      : (tm, N)  lane-dense output row tile
    """
    o_ref[...] = jnp.dot(x_tile_ref[...], xt_ref[...],
                         preferred_element_type=jnp.float32)


# --------------------------------- wrapper ---------------------------------- #

def _vmem_budget_bytes():
    """Usable VMEM budget for this chip (falls back to a v7x-safe 64 MiB)."""
    try:
        cap = pltpu.get_tpu_info().vmem_capacity_bytes
    except Exception:
        cap = 64 << 20
    return int(cap * 0.85)


def _pick_tm(N, F, budget):
    """Largest row tile whose per-step footprint (double-buffered adjacency/output
    tiles + resident (N,F) operand) fits the VMEM budget."""
    for tm in (1024, 512, 256, 128):
        if tm <= N and N % tm == 0 and tm % 128 == 0:
            footprint = 8 * tm * N * 4 // 4  # 2 bufs * (adj + out) tiles, f32
            footprint = 4 * (2 * tm * N + 2 * tm * F + 2 * N * F) + (2 << 20)
            if footprint <= budget:
                return tm
    return N  # small / irregular N: single full tile


def structure_decoder_forward(adj, h, w, b, *, tm=None):
    """adj: (N,N) f32 dense adjacency; h: (N,F); w: (F,F); b: (F,)."""
    N, F = h.shape
    adj = adj.astype(jnp.float32)
    h = h.astype(jnp.float32)
    w = w.astype(jnp.float32)

    budget = _vmem_budget_bytes()
    if tm is None:
        tm = _pick_tm(N, F, budget)
    assert N % tm == 0 and (tm == N or tm % 128 == 0)
    G = N // tm

    # Cheap O(N*F) XLA glue: fold the column-side normalization into the
    # projected features:  hw = (deg^{-1/2} * h) @ W.
    deg = jnp.sum(adj, axis=1, keepdims=True)
    d = jnp.where(deg > 0.0, jax.lax.rsqrt(jnp.maximum(deg, 1e-30)), 0.0)
    hw = jnp.dot(d * h, w, preferred_element_type=jnp.float32)
    b2 = b.reshape(1, F).astype(jnp.float32)

    # Per-call VMEM footprints (double-buffered tiles + resident inputs).
    est1 = 4 * (2 * tm * N + 2 * tm * F + 2 * N * F + 2 * 8 * 128)
    est2 = 4 * (2 * tm * N + 2 * tm * F + 2 * N * F)
    lim1 = int(min(max(est1 + (4 << 20), 16 << 20), budget))
    lim2 = int(min(max(est2 + (4 << 20), 16 << 20), budget))

    # ---- call 1: GCN + ReLU -> x (N, F) ---- #
    x = pl.pallas_call(
        gcn_kernel,
        out_shape=jax.ShapeDtypeStruct((N, F), jnp.float32),
        grid=(G,),
        in_specs=[
            pl.BlockSpec((tm, N), lambda i: (i, 0)),   # adjacency row tile
            pl.BlockSpec((N, F), lambda i: (0, 0)),    # hw   (resident)
            pl.BlockSpec((1, F), lambda i: (0, 0)),    # bias (resident)
        ],
        out_specs=pl.BlockSpec((tm, F), lambda i: (i, 0)),
        compiler_params=pltpu.CompilerParams(
            dimension_semantics=("parallel",),          # megacore split on v7x
            vmem_limit_bytes=lim1,
        ),
    )(adj, hw, b2)

    # One tiny (N,F)->(F,N) transpose, done once (not per grid step), so the
    # gram below is a canonical MXU matmul with a lane-dense output.
    xt = x.T

    # ---- call 2: gram  out = x @ x^T ---- #
    out = pl.pallas_call(
        gram_kernel,
        out_shape=jax.ShapeDtypeStruct((N, N), jnp.float32),
        grid=(G,),
        in_specs=[
            pl.BlockSpec((tm, F), lambda i: (i, 0)),   # rows of x for this tile
            pl.BlockSpec((F, N), lambda i: (0, 0)),    # full x^T (resident)
        ],
        out_specs=pl.BlockSpec((tm, N), lambda i: (i, 0)),
        compiler_params=pltpu.CompilerParams(
            dimension_semantics=("parallel",),
            vmem_limit_bytes=lim2,
        ),
    )(x, xt)
    return out


# -------------------------------- reference --------------------------------- #

def reference_forward(adj, h, w, b):
    deg = jnp.sum(adj, axis=1, keepdims=True)
    d = jnp.where(deg > 0, 1.0 / jnp.sqrt(deg), 0.0)
    a_norm = d * adj * d.T
    x = jnp.maximum(a_norm @ (h @ w) + b[None, :], 0.0)
    return x @ x.T


# ----------------------------------- main ------------------------------------ #

if __name__ == "__main__":
    N, nhid = 128, 32           # small graph: 128 nodes, hidden dim 32

    key = jax.random.PRNGKey(0)
    k_adj, k_h, k_w = jax.random.split(key, 3)

    # Symmetric binary adjacency with self-loops (no isolated nodes).
    a_rand = (jax.random.uniform(k_adj, (N, N)) < 0.05).astype(jnp.float32)
    adj = jnp.clip(a_rand + a_rand.T + jnp.eye(N, dtype=jnp.float32), 0.0, 1.0)

    # Node features and deterministic GraphConv parameters (xavier-ish W, zero bias).
    h = jax.random.normal(k_h, (N, nhid), dtype=jnp.float32)
    limit = (6.0 / (nhid + nhid)) ** 0.5
    w = jax.random.uniform(k_w, (nhid, nhid), dtype=jnp.float32,
                           minval=-limit, maxval=limit)
    b = jnp.zeros((nhid,), dtype=jnp.float32)

    out = structure_decoder_forward(adj, h, w, b)
    out = jax.block_until_ready(out)

    ref = reference_forward(adj, h, w, b)
    assert out.shape == (N, N)
    assert jnp.allclose(out, ref, atol=1e-4, rtol=1e-4), "mismatch vs reference"

    print("KERNEL_OK")
</pallas_src>

<mosaic_0001>
module attributes {stable_mosaic.version = 11 : i64} {
  func.func @gcn_kernel(%arg0: i32, %arg1: memref<128x128xf32, #tpu.memory_space<vmem>>, %arg2: memref<128x32xf32, #tpu.memory_space<vmem>>, %arg3: memref<1x32xf32, #tpu.memory_space<vmem>>, %arg4: memref<128x32xf32, #tpu.memory_space<vmem>>) attributes {dimension_semantics = [#tpu.dimension_semantics<parallel>], iteration_bounds = array<i64: 1>, scalar_prefetch = 0 : i64, scratch_operands = 0 : i64, tpu.core_type = #tpu.core_type<tc>, window_params = [{transform_indices = @transform_0, window_bounds = array<i64: 128, 128>}, {pipeline_mode = #tpu.pipeline_mode<synchronous>, transform_indices = @transform_1, window_bounds = array<i64: 128, 32>}, {pipeline_mode = #tpu.pipeline_mode<synchronous>, transform_indices = @transform_2, window_bounds = array<i64: 1, 32>}, {transform_indices = @transform_3, window_bounds = array<i64: 128, 32>}]} {
    %c0 = arith.constant 0 : index
    %c0_0 = arith.constant 0 : index
    %0 = vector.load %arg1[%c0, %c0_0] : memref<128x128xf32, #tpu.memory_space<vmem>>, vector<128x128xf32>
    %cst = arith.constant dense<0.000000e+00> : vector<128xf32>
    %1 = vector.multi_reduction <add>, %0, %cst [1] : vector<128x128xf32> to vector<128xf32>
    %2 = vector.shape_cast %1 : vector<128xf32> to vector<128x1xf32>
    %cst_1 = arith.constant 0.000000e+00 : f32
    %3 = vector.broadcast %cst_1 : f32 to vector<128x1xf32>
    %4 = arith.cmpf ogt, %2, %3 : vector<128x1xf32>
    %cst_2 = arith.constant 1.000000e-30 : f32
    %5 = vector.broadcast %cst_2 : f32 to vector<128x1xf32>
    %6 = arith.maximumf %2, %5 : vector<128x1xf32>
    %7 = math.rsqrt %6 : vector<128x1xf32>
    %cst_3 = arith.constant 0.000000e+00 : f32
    %8 = vector.broadcast %cst_3 : f32 to vector<128x1xf32>
    %9 = arith.select %4, %7, %8 : vector<128x1xi1>, vector<128x1xf32>
    %c0_4 = arith.constant 0 : index
    %c0_5 = arith.constant 0 : index
    %10 = vector.load %arg2[%c0_4, %c0_5] : memref<128x32xf32, #tpu.memory_space<vmem>>, vector<128x32xf32>
    %cst_6 = arith.constant dense<0.000000e+00> : vector<128x32xf32>
    %11 = tpu.matmul %0, %10, %cst_6 {dimension_numbers = #tpu.dot_dimension_numbers<[1], [0], [0], [1], [0, 0, 1, 1], [], []>} : vector<128x128xf32>, vector<128x32xf32>, vector<128x32xf32> -> vector<128x32xf32>
    %12 = vector.broadcast %9 : vector<128x1xf32> to vector<128x32xf32>
    %13 = arith.mulf %12, %11 : vector<128x32xf32>
    %c0_7 = arith.constant 0 : index
    %c0_8 = arith.constant 0 : index
    %14 = vector.load %arg3[%c0_7, %c0_8] : memref<1x32xf32, #tpu.memory_space<vmem>>, vector<1x32xf32>
    %15 = vector.broadcast %14 : vector<1x32xf32> to vector<128x32xf32>
    %16 = arith.addf %13, %15 : vector<128x32xf32>
    %cst_9 = arith.constant 0.000000e+00 : f32
    %17 = vector.broadcast %cst_9 : f32 to vector<128x32xf32>
    %18 = arith.maximumf %16, %17 : vector<128x32xf32>
    %c0_10 = arith.constant 0 : index
    %c0_11 = arith.constant 0 : index
    %19 = vector.load %arg4[%c0_10, %c0_11] : memref<128x32xf32, #tpu.memory_space<vmem>>, vector<128x32xf32>
    tpu.vector_store %arg4[%c0_10, %c0_11], %18 {strides = array<i32>} : memref<128x32xf32, #tpu.memory_space<vmem>>, vector<128x32xf32>,
    return
  }
  func.func @transform_0(%arg0: i32) -> (i32, i32) {
    %c0_i32 = arith.constant 0 : i32
    %c0_i32_0 = arith.constant 0 : i32
    return %arg0, %c0_i32 : i32, i32
  }
  func.func @transform_1(%arg0: i32) -> (i32, i32) {
    %c0_i32 = arith.constant 0 : i32
    %c0_i32_0 = arith.constant 0 : i32
    %c0_i32_1 = arith.constant 0 : i32
    return %c0_i32, %c0_i32_0 : i32, i32
  }
  func.func @transform_2(%arg0: i32) -> (i32, i32) {
    %c0_i32 = arith.constant 0 : i32
    %c0_i32_0 = arith.constant 0 : i32
    %c0_i32_1 = arith.constant 0 : i32
    return %c0_i32, %c0_i32_0 : i32, i32
  }
  func.func @transform_3(%arg0: i32) -> (i32, i32) {
    %c0_i32 = arith.constant 0 : i32
    %c0_i32_0 = arith.constant 0 : i32
    return %arg0, %c0_i32 : i32, i32
  }
}

</mosaic_0001>

<bundles_post_ra>
// kernel: tpu_custom_call.1
= control target key start
LH: loop header
LB: loop body
LE: loop exit
PB: predicated region body
PF: predicated region fallthrough
CT: control target
= control target key end

     0   :  { %vm342_vm6 = vcmask 261120   ;;  %s806_s1 = inlined_call_operand.vmem [shape: f32[128,32], index: 1, kind: input, shape index: {}]   ;;  %s807_s0 = inlined_call_operand.vmem [shape: f32[128,128], index: 0, kind: input, shape index: {}]   ;;  %s808_s2 = inlined_call_operand.vmem [shape: f32[1,32], index: 2, kind: input, shape index: {}]   ;;  %s809_s3 = inlined_call_operand.vmem [shape: f32[128,32], index: 3, kind: output, shape index: {}]  }
   0x1   :  { %v141_v0 = vld [vmem:[%s806_s1 + $0x78] sm:$0xff]  ;;  %v140_v1 = vld [vmem:[%s806_s1 + $0x70] sm:$0xff]  ;;  %v139_v2 = vld [vmem:[%s806_s1 + $0x68] sm:$0xff] }
   0x2   :  { %396 = vmatprep.subr.mxu0 %v141_v0  ;;  %452 = vmatprep.subr.mxu1 %v141_v0  ;;  %v138_v3 = vld [vmem:[%s806_s1 + $0x60] sm:$0xff]  ;;  %v137_v4 = vld [vmem:[%s806_s1 + $0x58] sm:$0xff]  ;;  %v136_v5 = vld [vmem:[%s806_s1 + $0x50] sm:$0xff] }
   0x3   :  { %397 = vmatpush3.msra.mxu0 %v141_v0  ;;  %468 = vmatpush3.msra.mxu1 %v141_v0  ;;  %v135_v6 = vld [vmem:[%s806_s1 + $0x48] sm:$0xff]  ;;  %v134_v7 = vld [vmem:[%s806_s1 + $0x40] sm:$0xff]  ;;  %v133_v8 = vld [vmem:[%s806_s1 + $0x38] sm:$0xff] }
   0x4   :  { %398 = vmatprep.subr.mxu0 %v140_v1  ;;  %453 = vmatprep.subr.mxu1 %v140_v1  ;;  %v132_v9 = vld [vmem:[%s806_s1 + $0x30] sm:$0xff]  ;;  %v131_v10 = vld [vmem:[%s806_s1 + $0x28] sm:$0xff]  ;;  %v130_v11 = vld [vmem:[%s806_s1 + $0x20] sm:$0xff] }
   0x5   :  { %399 = vmatpush3.msra.mxu0 %v140_v1  ;;  %469 = vmatpush3.msra.mxu1 %v140_v1  ;;  %v129_v12 = vld [vmem:[%s806_s1 + $0x18] sm:$0xff]  ;;  %v128_v13 = vld [vmem:[%s806_s1 + $0x10] sm:$0xff]  ;;  %v127_v14 = vld [vmem:[%s806_s1 + $0x8] sm:$0xff] }
   0x6   :  { %400 = vmatprep.subr.mxu0 %v139_v2  ;;  %454 = vmatprep.subr.mxu1 %v139_v2  ;;  %v126_v15 = vld [vmem:[%s806_s1] sm:$0xff]  ;;  %v15_v18 = vld [vmem:[%s807_s0 + $0x8] sm:$0xff]  ;;  %v16_v20 = vld [vmem:[%s807_s0 + $0x10] sm:$0xff] }
   0x7   :  { %401 = vmatpush3.msra.mxu0 %v139_v2  ;;  %470 = vmatpush3.msra.mxu1 %v139_v2  ;;  %v14_v16 = vld [vmem:[%s807_s0] sm:$0xff]  ;;  %v23_v19 = vld [vmem:[%s807_s0 + $0x48] sm:$0xff]  ;;  %v24_v21 = vld [vmem:[%s807_s0 + $0x50] sm:$0xff] }
   0x8   :  { %402 = vmatprep.subr.mxu0 %v138_v3  ;;  %455 = vmatprep.subr.mxu1 %v138_v3  ;;  %v22_v17 = vld [vmem:[%s807_s0 + $0x40] sm:$0xff]  ;;  %v17_v22 = vld [vmem:[%s807_s0 + $0x18] sm:$0xff]  ;;  %v19_v26 = vld [vmem:[%s807_s0 + $0x28] sm:$0xff] }
   0x9   :  { %403 = vmatpush3.msra.mxu0 %v138_v3  ;;  %471 = vmatpush3.msra.mxu1 %v138_v3  ;;  %v25_v23 = vld [vmem:[%s807_s0 + $0x58] sm:$0xff]  ;;  %v18_v24 = vld [vmem:[%s807_s0 + $0x20] sm:$0xff]  ;;  %v27_v27 = vld [vmem:[%s807_s0 + $0x68] sm:$0xff] }
   0xa   :  { %404 = vmatprep.subr.mxu0 %v137_v4  ;;  %456 = vmatprep.subr.mxu1 %v137_v4  ;;  %v26_v25 = vld [vmem:[%s807_s0 + $0x60] sm:$0xff]  ;;  %v20_v28 = vld [vmem:[%s807_s0 + $0x30] sm:$0xff]  ;;  %v21_v30 = vld [vmem:[%s807_s0 + $0x38] sm:$0xff] }
   0xb   :  { %405 = vmatpush3.msra.mxu0 %v137_v4  ;;  %472 = vmatpush3.msra.mxu1 %v137_v4  ;;  %v28_v29 = vld [vmem:[%s807_s0 + $0x70] sm:$0xff]  ;;  %v29_v31 = vld [vmem:[%s807_s0 + $0x78] sm:$0xff] }
   0xc   :  { %406 = vmatprep.subr.mxu0 %v136_v5  ;;  %457 = vmatprep.subr.mxu1 %v136_v5 }
   0xd   :  { %407 = vmatpush3.msra.mxu0 %v136_v5  ;;  %473 = vmatpush3.msra.mxu1 %v136_v5 }
   0xe   :  { %408 = vmatprep.subr.mxu0 %v135_v6  ;;  %458 = vmatprep.subr.mxu1 %v135_v6 }
   0xf   :  { %409 = vmatpush3.msra.mxu0 %v135_v6  ;;  %474 = vmatpush3.msra.mxu1 %v135_v6 }
  0x10   :  { %410 = vmatprep.subr.mxu0 %v134_v7  ;;  %459 = vmatprep.subr.mxu1 %v134_v7 }
  0x11   :  { %411 = vmatpush3.msra.mxu0 %v134_v7  ;;  %475 = vmatpush3.msra.mxu1 %v134_v7 }
  0x12   :  { %412 = vmatprep.subr.mxu0 %v133_v8  ;;  %460 = vmatprep.subr.mxu1 %v133_v8 }
  0x13   :  { %413 = vmatpush3.msra.mxu0 %v133_v8  ;;  %476 = vmatpush3.msra.mxu1 %v133_v8 }
  0x14   :  { %414 = vmatprep.subr.mxu0 %v132_v9  ;;  %461 = vmatprep.subr.mxu1 %v132_v9 }
  0x15   :  { %415 = vmatpush3.msra.mxu0 %v132_v9  ;;  %477 = vmatpush3.msra.mxu1 %v132_v9  ;;  %v687_v9 = vld [vmem:[%s808_s2] ss:$0 sm:$0xff] }
  0x16   :  { %416 = vmatprep.subr.mxu0 %v131_v10  ;;  %462 = vmatprep.subr.mxu1 %v131_v10 }
  0x17   :  { %417 = vmatpush3.msra.mxu0 %v131_v10  ;;  %478 = vmatpush3.msra.mxu1 %v131_v10 }
  0x18   :  { %418 = vmatprep.subr.mxu0 %v130_v11  ;;  %463 = vmatprep.subr.mxu1 %v130_v11 }
  0x19   :  { %419 = vmatpush3.msra.mxu0 %v130_v11  ;;  %479 = vmatpush3.msra.mxu1 %v130_v11 }
  0x1a   :  { %420 = vmatprep.subr.mxu0 %v129_v12  ;;  %464 = vmatprep.subr.mxu1 %v129_v12 }
  0x1b   :  { %421 = vmatpush3.msra.mxu0 %v129_v12  ;;  %480 = vmatpush3.msra.mxu1 %v129_v12 }
  0x1c   :  { %422 = vmatprep.subr.mxu0 %v128_v13  ;;  %465 = vmatprep.subr.mxu1 %v128_v13 }
  0x1d   :  { %423 = vmatpush3.msra.mxu0 %v128_v13  ;;  %481 = vmatpush3.msra.mxu1 %v128_v13 }
  0x1e   :  { %424 = vmatprep.subr.mxu0 %v127_v14  ;;  %466 = vmatprep.subr.mxu1 %v127_v14 }
  0x1f   :  { %425 = vmatpush3.msra.mxu0 %v127_v14  ;;  %482 = vmatpush3.msra.mxu1 %v127_v14 }
  0x20   :  { %426 = vmatprep.subr.mxu0 %v126_v15  ;;  %467 = vmatprep.subr.mxu1 %v126_v15 }
  0x21   :  { %427 = vmatpush3.msra.mxu0 %v126_v15  ;;  %483 = vmatpush3.msra.mxu1 %v126_v15 }
  0x22   :  { %428 = vmatprep.mubr.f32.mxu0 %v14_v16  ;;  %440 = vmatprep.mubr.f32.mxu1 %v22_v17 }
  0x23   :  { %429 = vmatmul.mubr.f32.vlgmr.msra.gmra.mxu0 %v15_v18  ;;  %441 = vmatmul.mubr.f32.vlgmr.msra.gmra.mxu1 %v23_v19 }
  0x24   :  { %431 = vmatprep.mubr.f32.mxu0 %v16_v20  ;;  %443 = vmatprep.mubr.f32.mxu1 %v24_v21 }
  0x25   :  { %34 = vadd.xlane.f32.xlu1 %v16_v20  ;;  %30 = vadd.xlane.f32.xlu0 %v14_v16 }
  0x27   :  { %432 = vmatmul.mubr.f32.gmra.mxu0 %v17_v22  ;;  %444 = vmatmul.mubr.f32.gmra.mxu1 %v25_v23 }
  0x28   :  { %434 = vmatprep.mubr.f32.mxu0 %v18_v24  ;;  %446 = vmatprep.mubr.f32.mxu1 %v26_v25 }
  0x29   :  { %36 = vadd.xlane.f32.xlu1 %v17_v22  ;;  %32 = vadd.xlane.f32.xlu0 %v15_v18 }
  0x2b   :  { %435 = vmatmul.mubr.f32.gmra.mxu0 %v19_v26  ;;  %447 = vmatmul.mubr.f32.gmra.mxu1 %v27_v27 }
  0x2c   :  { %437 = vmatprep.mubr.f32.mxu0 %v20_v28  ;;  %449 = vmatprep.mubr.f32.mxu1 %v28_v29 }
  0x2d   :  { %40 = vadd.xlane.f32.xlu1 %v19_v26  ;;  %38 = vadd.xlane.f32.xlu0 %v18_v24 }
  0x2f   :  { %438 = vmatmul.mubr.f32.gmra.mxu0 %v21_v30  ;;  %450 = vmatmul.mubr.f32.gmra.mxu1 %v29_v31 }
  0x31   :  { %44 = vadd.xlane.f32.xlu1 %v21_v30  ;;  %42 = vadd.xlane.f32.xlu0 %v20_v28 }
  0x35   :  { %48 = vadd.xlane.f32.xlu1 %v23_v19  ;;  %46 = vadd.xlane.f32.xlu0 %v22_v17 }
  0x39   :  { %52 = vadd.xlane.f32.xlu1 %v25_v23  ;;  %50 = vadd.xlane.f32.xlu0 %v24_v21 }
  0x3d   :  { %56 = vadd.xlane.f32.xlu1 %v27_v27  ;;  %54 = vadd.xlane.f32.xlu0 %v26_v25 }
  0x41   :  { %60 = vadd.xlane.f32.xlu1 %v29_v31  ;;  %58 = vadd.xlane.f32.xlu0 %v28_v29 }
  0xae   :  { %v632_v32 = vpop.xlane.xlu1 %34  ;;  %v634_v33 = vpop.xlane.xlu0 %30 }
  0xaf   :  { %v80_v42 = vmax.f32 %v632_v32, 1e-30  ;;  %v78_v44 = vmax.f32 %v634_v33, 1e-30  ;;  %vm62_vm2 = vcmp.gt.f32.partialorder %v634_v33, 0.0  ;;  %vm64_vm3 = vcmp.gt.f32.partialorder %v632_v32, 0.0 }
  0xb1   :  { %484 = vrsqrt.f32 %v80_v42 }
  0xb2   :  { %v636_v34 = vpop.xlane.xlu1 %36  ;;  %v638_v35 = vpop.xlane.xlu0 %32  ;;  %486 = vrsqrt.f32 %v78_v44 }
  0xb3   :  { %v79_v45 = vmax.f32 %v638_v35, 1e-30  ;;  %v81_v48 = vmax.f32 %v636_v34, 1e-30  ;;  %vm63_vm0 = vcmp.gt.f32.partialorder %v638_v35, 0.0  ;;  %vm65_vm4 = vcmp.gt.f32.partialorder %v636_v34, 0.0 }
  0xb5   :  { %488 = vrsqrt.f32 %v79_v45 }
  0xb6   :  { %v640_v36 = vpop.xlane.xlu1 %40  ;;  %v642_v37 = vpop.xlane.xlu0 %38 }
  0xb7   :  { %v83_v50 = vmax.f32 %v640_v36, 1e-30  ;;  %v82_v53 = vmax.f32 %v642_v37, 1e-30  ;;  %vm67_vm7 = vcmp.gt.f32.partialorder %v640_v36, 0.0  ;;  %vm66_vm8 = vcmp.gt.f32.partialorder %v642_v37, 0.0 }
  0xba   :  { %v644_v38 = vpop.xlane.xlu1 %44  ;;  %v646_v39 = vpop.xlane.xlu0 %42 }
  0xbb   :  { %v85_v59 = vmax.f32 %v644_v38, 1e-30  ;;  %v84_v62 = vmax.f32 %v646_v39, 1e-30  ;;  %vm69_vm9 = vcmp.gt.f32.partialorder %v644_v38, 0.0  ;;  %vm68_vm12 = vcmp.gt.f32.partialorder %v646_v39, 0.0 }
  0xbe   :  { %v49_v40 = vpop.xlane.xlu1 %48  ;;  %v648_v41 = vpop.xlane.xlu0 %46 }
  0xbf   :  { %v87_v47 = vmax.f32 %v49_v40, 1e-30  ;;  %v86_v49 = vmax.f32 %v648_v41, 1e-30  ;;  %v485_v63 = vpop.eup %484  ;;  %vm71_vm1 = vcmp.gt.f32.partialorder %v49_v40, 0.0  ;;  %vm70_vm5 = vcmp.gt.f32.partialorder %v648_v41, 0.0 }
  0xc0   :  { %v487_v1 = vpop.eup %486  ;;  %v112_v21 = vsel %vm64_vm3, %v485_v63, 0.0 }
  0xc1   :  { %490 = vrsqrt.f32 %v87_v47  ;;  %v110_v15 = vsel %vm62_vm2, %v487_v1, 0.0 }
  0xc2   :  { %v651_v43 = vpop.xlane.xlu1 %52  ;;  %v655_v46 = vpop.xlane.xlu0 %50  ;;  %492 = vrsqrt.f32 %v81_v48 }
  0xc3   :  { %v89_v52 = vmax.f32 %v651_v43, 1e-30  ;;  %494 = vrsqrt.f32 %v86_v49  ;;  %v88_v55 = vmax.f32 %v655_v46, 1e-30  ;;  %v489_v2 = vpop.eup %488  ;;  %vm73_vm10 = vcmp.gt.f32.partialorder %v651_v43, 0.0 }
  0xc4   :  { %496 = vrsqrt.f32 %v83_v50  ;;  %v111_v7 = vsel %vm63_vm0, %v489_v2, 0.0  ;;  %vm72_vm11 = vcmp.gt.f32.partialorder %v655_v46, 0.0 }
  0xc5   :  { %498 = vrsqrt.f32 %v89_v52 }
  0xc6   :  { %v660_v51 = vpop.xlane.xlu1 %56  ;;  %v664_v54 = vpop.xlane.xlu0 %54  ;;  %500 = vrsqrt.f32 %v82_v53 }
  0xc7   :  { %v91_v56 = vmax.f32 %v660_v51, 1e-30  ;;  %502 = vrsqrt.f32 %v88_v55  ;;  %v90_v58 = vmax.f32 %v664_v54, 1e-30  ;;  %vm75_vm13 = vcmp.gt.f32.partialorder %v660_v51, 0.0 }
  0xc8   :  { %vm74_vm14 = vcmp.gt.f32.partialorder %v664_v54, 0.0 }
  0xc9   :  { %504 = vrsqrt.f32 %v91_v56 }
  0xca   :  { %v668_v57 = vpop.xlane.xlu1 %60  ;;  %v672_v60 = vpop.xlane.xlu0 %58  ;;  %506 = vrsqrt.f32 %v90_v58 }
  0xcb   :  { %v93_v61 = vmax.f32 %v668_v57, 1e-30  ;;  %v92_v0 = vmax.f32 %v672_v60, 1e-30  ;;  %508 = vrsqrt.f32 %v85_v59  ;;  %vm77_vm15 = vcmp.gt.f32.partialorder %v668_v57, 0.0 }
  0xcc   :  { %vm76_vm0 = vcmp.gt.f32.partialorder %v672_v60, 0.0 }
  0xcd   :  { %510 = vrsqrt.f32 %v93_v61 }
  0xce   :  { %v491_v3 = vpop.eup %490  ;;  %512 = vrsqrt.f32 %v84_v62 }
  0xcf   :  { %v493_v4 = vpop.eup %492  ;;  %514 = vrsqrt.f32 %v92_v0  ;;  %v119_v10 = vsel %vm71_vm1, %v491_v3, 0.0 }
  0xd0   :  { %v495_v5 = vpop.eup %494  ;;  %v113_v20 = vsel %vm65_vm4, %v493_v4, 0.0 }
  0xd1   :  { %v497_v6 = vpop.eup %496  ;;  %v118_v18 = vsel %vm70_vm5, %v495_v5, 0.0 }
  0xd2   :  { %v499_v12 = vpop.eup %498  ;;  %v115_v30 = vsel %vm67_vm7, %v497_v6, 0.0 }
  0xd3   :  { %v501_v16 = vpop.eup %500  ;;  %v121_v28 = vsel %vm73_vm10, %v499_v12, 0.0 }
  0xd4   :  { %v503_v22 = vpop.eup %502  ;;  %v114_v43 = vsel %vm66_vm8, %v501_v16, 0.0 }
  0xd5   :  { %v120_v44 = vsel %vm72_vm11, %v503_v22, 0.0 }
  0xd6   :  { %v505_v31 = vpop.eup %504 }
  0xd7   :  { %v507_v47 = vpop.eup %506  ;;  %v123_v55 = vsel %vm75_vm13, %v505_v31, 0.0 }
  0xd8   :  { %v509_v50 = vpop.eup %508  ;;  %v122_v3 = vsel %vm74_vm14, %v507_v47, 0.0 }
  0xd9   :  { %v117_v12 = vsel %vm69_vm9, %v509_v50, 0.0 }
  0xda   :  { %v511_v58 = vpop.eup %510 }
  0xdb   :  { %v513_v51 = vpop.eup %512 }
  0xdc   :  { %v515_v5 = vpop.eup %514 }
  0xdd   :  { %v124_v22 = vsel %vm76_vm0, %v515_v5, 0.0 }
  0xe3   :  { %v430_v8 = vpop.f32.mrf.mxu0  ;;  %v442_v11 = vpop.f32.mrf.mxu1 }
  0xe4   :  { %v288_v13 = vmul.f32 %v430_v8, %v111_v7  ;;  %v296_v14 = vmul.f32 %v442_v11, %v119_v10 }
  0xe5   :  { %v208_v17 = vpop.f32.mrf.mxu0  ;;  %v248_v19 = vpop.f32.mrf.mxu1 }
  0xe6   :  { %v311_v23 = vadd.f32 %v687_v9, %v288_v13  ;;  %v319_v24 = vadd.f32 %v687_v9, %v296_v14  ;;  %v287_v25 = vmul.f32 %v208_v17, %v110_v15  ;;  %v295_v26 = vmul.f32 %v248_v19, %v118_v18 }
  0xe7   :  { %v433_v27 = vpop.f32.mrf.mxu0  ;;  %v445_v29 = vpop.f32.mrf.mxu1  ;;  %v125_v14 = vsel %vm77_vm15, %v511_v58, 0.0 }
  0xe8   :  { %v327_v32 = vmax.f32 %v311_v23, 0.0  ;;  %v335_v33 = vmax.f32 %v319_v24, 0.0  ;;  %v310_v34 = vadd.f32 %v687_v9, %v287_v25  ;;  %v318_v35 = vadd.f32 %v687_v9, %v295_v26 }
  0xe9   :  { %v290_v40 = vmul.f32 %v433_v27, %v113_v20  ;;  %v298_v41 = vmul.f32 %v445_v29, %v121_v28  ;;  %v218_v42 = vpop.f32.mrf.mxu0  ;;  %v258_v45 = vpop.f32.mrf.mxu1  ;;  %v116_v20 = vsel %vm68_vm12, %v513_v51, 0.0 }
  0xea   :  { %344 = vst.msk [vmem:[%s809_s3 + $0x8] sm:$0xff] %vm342_vm6, %v327_v32  ;;  %352 = vst.msk [vmem:[%s809_s3 + $0x48] sm:$0xff] %vm342_vm6, %v335_v33  ;;  %v326_v36 = vmax.f32 %v310_v34, 0.0  ;;  %v334_v48 = vmax.f32 %v318_v35, 0.0  ;;  %v289_v49 = vmul.f32 %v218_v42, %v112_v21  ;;  %v297_v46 = vmul.f32 %v258_v45, %v120_v44 }
  0xeb   :  { %v313_v37 = vadd.f32 %v687_v9, %v290_v40  ;;  %v321_v52 = vadd.f32 %v687_v9, %v298_v41  ;;  %v436_v53 = vpop.f32.mrf.mxu0  ;;  %v448_v56 = vpop.f32.mrf.mxu1 }
  0xec   :  { %343 = vst.msk [vmem:[%s809_s3] sm:$0xff] %vm342_vm6, %v326_v36  ;;  %351 = vst.msk [vmem:[%s809_s3 + $0x40] sm:$0xff] %vm342_vm6, %v334_v48  ;;  %v312_v59 = vadd.f32 %v687_v9, %v289_v49  ;;  %v320_v61 = vadd.f32 %v687_v9, %v297_v46  ;;  %v292_v62 = vmul.f32 %v436_v53, %v115_v30 }
  0xed   :  { %v300_v63 = vmul.f32 %v448_v56, %v123_v55  ;;  %v329_v0 = vmax.f32 %v313_v37, 0.0  ;;  %v337_v1 = vmax.f32 %v321_v52, 0.0  ;;  %v228_v2 = vpop.f32.mrf.mxu0  ;;  %v268_v4 = vpop.f32.mrf.mxu1 }
  0xee   :  { %v328_v6 = vmax.f32 %v312_v59, 0.0  ;;  %v336_v7 = vmax.f32 %v320_v61, 0.0  ;;  %v315_v8 = vadd.f32 %v687_v9, %v292_v62  ;;  %v291_v54 = vmul.f32 %v228_v2, %v114_v43 }
  0xef   :  { %v323_v10 = vadd.f32 %v687_v9, %v300_v63  ;;  %346 = vst.msk [vmem:[%s809_s3 + $0x18] sm:$0xff] %vm342_vm6, %v329_v0  ;;  %354 = vst.msk [vmem:[%s809_s3 + $0x58] sm:$0xff] %vm342_vm6, %v337_v1  ;;  %v299_v11 = vmul.f32 %v268_v4, %v122_v3  ;;  %v439_v13 = vpop.f32.mrf.mxu0  ;;  %v451_v15 = vpop.f32.mrf.mxu1 }
  0xf0   :  { %345 = vst.msk [vmem:[%s809_s3 + $0x10] sm:$0xff] %vm342_vm6, %v328_v6  ;;  %353 = vst.msk [vmem:[%s809_s3 + $0x50] sm:$0xff] %vm342_vm6, %v336_v7  ;;  %v331_v16 = vmax.f32 %v315_v8, 0.0  ;;  %v294_v18 = vmul.f32 %v439_v13, %v117_v12  ;;  %v302_v38 = vmul.f32 %v451_v15, %v125_v14  ;;  %v314_v19 = vadd.f32 %v687_v9, %v291_v54 }
  0xf1   :  { %v339_v17 = vmax.f32 %v323_v10, 0.0  ;;  %v322_v57 = vadd.f32 %v687_v9, %v299_v11  ;;  %v238_v21 = vpop.f32.mrf.mxu0  ;;  %v278_v23 = vpop.f32.mrf.mxu1 }
  0xf2   :  { %348 = vst.msk [vmem:[%s809_s3 + $0x28] sm:$0xff] %vm342_vm6, %v331_v16  ;;  %v317_v24 = vadd.f32 %v687_v9, %v294_v18  ;;  %v325_v39 = vadd.f32 %v687_v9, %v302_v38  ;;  %v293_v25 = vmul.f32 %v238_v21, %v116_v20  ;;  %v301_v26 = vmul.f32 %v278_v23, %v124_v22 }
  0xf3   :  { %356 = vst.msk [vmem:[%s809_s3 + $0x68] sm:$0xff] %vm342_vm6, %v339_v17  ;;  %v330_v27 = vmax.f32 %v314_v19, 0.0  ;;  %v338_v60 = vmax.f32 %v322_v57, 0.0 }
  0xf4   :  { %v333_v28 = vmax.f32 %v317_v24, 0.0  ;;  %v341_v29 = vmax.f32 %v325_v39, 0.0  ;;  %v316_v30 = vadd.f32 %v687_v9, %v293_v25  ;;  %v324_v31 = vadd.f32 %v687_v9, %v301_v26 }
  0xf5   :  { %347 = vst.msk [vmem:[%s809_s3 + $0x20] sm:$0xff] %vm342_vm6, %v330_v27  ;;  %355 = vst.msk [vmem:[%s809_s3 + $0x60] sm:$0xff] %vm342_vm6, %v338_v60 }
  0xf6   :  { %350 = vst.msk [vmem:[%s809_s3 + $0x38] sm:$0xff] %vm342_vm6, %v333_v28  ;;  %358 = vst.msk [vmem:[%s809_s3 + $0x78] sm:$0xff] %vm342_vm6, %v341_v29  ;;  %v332_v9 = vmax.f32 %v316_v30, 0.0  ;;  %v340_v32 = vmax.f32 %v324_v31, 0.0 }
  0xf8   :  { %349 = vst.msk [vmem:[%s809_s3 + $0x30] sm:$0xff] %vm342_vm6, %v332_v9  ;;  %357 = vst.msk [vmem:[%s809_s3 + $0x70] sm:$0xff] %vm342_vm6, %v340_v32 }

</bundles_post_ra>
